<compile_context>
chip_gen: v6e
topology: v6e:2x2x1
jax: 0.10.0
libtpu: 0.0.40
codegen_flags: <defaults>
</compile_context>

<pallas_src>
import jax
import jax.numpy as jnp
from jax.experimental import pallas as pl
from jax.experimental.pallas import tpu as pltpu
import numpy as np


def fill_kernel(fill_ref, o_ref):
    # fill_ref: (1,) f32 in SMEM. Pure broadcast store -- no mul, no input DMA.
    o_ref[...] = jnp.broadcast_to(fill_ref[0], o_ref.shape)


def _pallas_constant_fill(S: int, fill_value: float) -> jax.Array:
    """ones(S, S) * fill_value, computed by a Pallas store-only kernel."""
    fill_arr = jnp.full((1,), fill_value, dtype=jnp.float32)
    out_shape = jax.ShapeDtypeStruct((S, S), jnp.float32)
    out_bytes = S * S * 4
    cost = pl.CostEstimate(flops=0, transcendentals=0,
                           bytes_accessed=out_bytes + 4)

    smem_spec = pl.BlockSpec(memory_space=pltpu.MemorySpace.SMEM)

    # Small outputs: single full-array block (block == full dims, so arbitrary
    # odd S is fine); launch overhead dominates, pipelining buys nothing.
    small_threshold = 1 * 1024 * 1024  # 1 MiB
    if out_bytes <= small_threshold:
        return pl.pallas_call(
            fill_kernel,
            out_shape=out_shape,
            in_specs=[smem_spec],
            out_specs=pl.BlockSpec((S, S), lambda: (0, 0)),
            cost_estimate=cost,
        )(fill_arr)

    # Tiled path: row-tiled, lane-dense (last dim = full S).
    row_bytes = S * 4
    max_tile_bytes = 8 * 1024 * 1024  # 8 MiB/tile, 16 MiB double-buffered (v7x-safe)
    tm_max = max(8, (max_tile_bytes // row_bytes) // 8 * 8)

    # Balanced tiles: >= 2 steps (pipelining), even count (v7x dual-TC split),
    # tm rounded up to a multiple of 8 (sublane alignment).
    num_tiles = max(2, pl.cdiv(S, tm_max))
    if num_tiles % 2:
        num_tiles += 1
    tm = ((pl.cdiv(S, num_tiles) + 7) // 8) * 8
    grid = (pl.cdiv(S, tm),)

    # TODO(synk): for absurdly large S (row_bytes > max_tile_bytes, i.e.
    # S > ~2M) a single (8, S) row-tile no longer fits VMEM and column tiling
    # would be needed; out of scope for this module's realistic sizes.

    return pl.pallas_call(
        fill_kernel,
        out_shape=out_shape,
        grid=grid,
        in_specs=[smem_spec],
        out_specs=pl.BlockSpec((tm, S), lambda i: (i, 0)),
        compiler_params=pltpu.CompilerParams(
            dimension_semantics=("parallel",),
        ),
        cost_estimate=cost,
    )(fill_arr)


def test_module_forward(x):
    """Pallas equivalent of TestModule.forward (SubModule.forward)."""
    # Data-dependent output shape: must be resolved on the host.
    # (Blocking device->host read is unavoidable; matches torch semantics.)
    sz = int(x[0])
    S = sz if sz % 2 == 0 else sz + 1
    fill_value = float(sz + 1)
    return _pallas_constant_fill(S, fill_value)


if __name__ == "__main__":
    key = jax.random.PRNGKey(0)
    # Small deterministic integer input; x[0] drives the output size/value.
    x = jax.random.randint(key, (4,), minval=2, maxval=10, dtype=jnp.int32)

    out = jax.block_until_ready(test_module_forward(x))

    # Reference semantics (matches SubModule.forward exactly).
    sz = int(x[0])
    S = sz if sz % 2 == 0 else sz + 1
    ref = np.ones((S, S), dtype=np.float32) * (sz + 1)

    assert out.shape == (S, S), (out.shape, (S, S))
    assert out.dtype == jnp.float32
    np.testing.assert_allclose(np.asarray(out), ref, rtol=0, atol=0)

    # Exercise the other (odd/even) branch too for coverage.
    x2 = jnp.array([sz + 1, 0, 0, 0], dtype=jnp.int32)
    out2 = jax.block_until_ready(test_module_forward(x2))
    sz2 = sz + 1
    S2 = sz2 if sz2 % 2 == 0 else sz2 + 1
    ref2 = np.ones((S2, S2), dtype=np.float32) * (sz2 + 1)
    np.testing.assert_allclose(np.asarray(out2), ref2, rtol=0, atol=0)

    # Exercise the tiled (>1 MiB) path: 2048 is even -> S = 2048,
    # 2048*2048*4B = 16 MiB -> balanced 2-step (or more) grid.
    big = 2048
    x3 = jnp.array([big, 0, 0, 0], dtype=jnp.int32)
    out3 = jax.block_until_ready(test_module_forward(x3))
    assert out3.shape == (big, big)
    assert float(out3[0, 0]) == float(big + 1)
    assert float(out3[-1, -1]) == float(big + 1)

    print("KERNEL_OK")
</pallas_src>

<mosaic_0001>
module attributes {stable_mosaic.version = 11 : i64} {
  func.func @fill_kernel(%arg0: memref<1xf32, #tpu.memory_space<smem>>, %arg1: memref<8x8xf32, #tpu.memory_space<vmem>>) attributes {dimension_semantics = [], scalar_prefetch = 0 : i64, scratch_operands = 0 : i64, tpu.core_type = #tpu.core_type<tc>} {
    %c0 = arith.constant 0 : index
    %0 = memref.load %arg0[%c0] : memref<1xf32, #tpu.memory_space<smem>>
    %1 = vector.broadcast %0 : f32 to vector<8x8xf32>
    %c0_0 = arith.constant 0 : index
    %c0_1 = arith.constant 0 : index
    %2 = vector.load %arg1[%c0_0, %c0_1] : memref<8x8xf32, #tpu.memory_space<vmem>>, vector<8x8xf32>
    tpu.vector_store %arg1[%c0_0, %c0_1], %1 {strides = array<i32>} : memref<8x8xf32, #tpu.memory_space<vmem>>, vector<8x8xf32>,
    return
  }
}

</mosaic_0001>

<bundles_post_ra>
// kernel: tpu_custom_call.1
= control target key start
LH: loop header
LB: loop body
LE: loop exit
PB: predicated region body
PF: predicated region fallthrough
CT: control target
= control target key end

     0   :  { %vm12_vm0 = vcmask 64512   ;;  %s68_s0 = inlined_call_operand.<no memory space> [shape: f32[1], index: 0, kind: input, shape index: {}]   ;;  %s69_s1 = inlined_call_operand.hbm [shape: f32[8,8], index: 1, kind: output, shape index: {}]  }
   0x1   :  { %v11_v0 = vstv %s68_s0 }
   0x2   :  { %7 = vsyncpa [#allocation4], 0  ;;  %13 = vst.msk [vmem:[#allocation3] sm:$0xff] %vm12_vm0, %v11_v0  ;;  %s51_s8 = smov [#allocation3]  }
   0x3   :  { %s20_s9 = sshll.u32 %s51_s8, 4  ;;  %s21_s9 = int_to_ptr.vmem [resolvable:$true] %s20_s9 }
   0x4   :  { %s29_s10 = scalar_lea.vmem %s21_s9, 128  ;;  %p34_p1 = scmp.lt.s32.totalorder %s21_s9, %s21_s9 }
   0x5   :  { %p30_p0 = scmp.ne.s32.totalorder %s21_s9, %s29_s10  ;;  %p35_p2 = scmp.lt.s32.totalorder %s29_s10, %s29_s10 }
   0x7   :  { %p36_p3 = por %p35_p2, %p34_p1 }
   0x9   :  { %p37_p4 = pnand %p36_p3, %p30_p0 }
   0xb   :  { %40 = shalt.err (!%p37_p4)
}
   0xc   :  { %23 = dma.vmem_to_hbm [thread:$0]  %s21_s9, 128, %s69_s1, [#allocation4]  }
   0xd   :  { %49 = dma.done.wait [#allocation4], 128  }
   0xe   :  { %50 = vsyncadd [#allocation4], 4294967168 }
   0xf   :  { %27 = vsyncpa [#allocation4], 1 }

</bundles_post_ra>
